<compile_context>
chip_gen: v7x
topology: tpu7x:2x2x1
jax: 0.10.0
libtpu: 0.0.40
codegen_flags: <defaults>
</compile_context>

<pallas_src>
import numpy as np
import jax
import jax.numpy as jnp
from jax.experimental import pallas as pl
from jax.experimental.pallas import tpu as pltpu


FEATURE_COLS = [
    'HUFL', 'HULL', 'MUFL', 'MULL', 'LUFL', 'LULL', 'OT',
    'sin_hour', 'cos_hour', 'sin_wd', 'cos_wd',
    'OT_rollmean_24', 'OT_rollmean_48', 'OT_rollmean_168',
    'OT_rollstd_24', 'OT_rollstd_48', 'OT_rollstd_168',
    'OT_lag_24', 'OT_lag_48', 'OT_lag_168',
    'OT_diff_24', 'OT_diff_48', 'OT_diff_168',
]

INPUT_LEN = 172
PRED_LEN = 96

_LANE = 128
_SUBLANE = 8
_MAX_BLOCK_B = 1024


def _moving_avg_matrix(L, kernel_size):
    """Static (L, L) matrix s.t. (x @ M)[t] == MovingAvg_K(x)[t].

    MovingAvg replicates the first/last time step (kernel_size-1)//2 times and
    then applies AvgPool1d(kernel_size, stride=1, padding=0), i.e.
        trend[t] = (1/K) * sum_k x[clip(t + k - pad, 0, L-1)].
    """
    pad = (kernel_size - 1) // 2
    m = np.zeros((L, L), dtype=np.float32)
    inv_k = 1.0 / kernel_size
    for t in range(L):
        for k in range(kernel_size):
            src = min(max(t + k - pad, 0), L - 1)
            m[src, t] += inv_k
    return jnp.asarray(m)


def _round_up(x, m):
    return ((x + m - 1) // m) * m


def _choose_batch_tiling(B):
    """Pick (block_b, n_steps): 8-aligned tiles, <= 1024 rows, >= 2 steps when possible."""
    b_pad8 = _round_up(B, _SUBLANE)
    if b_pad8 <= _SUBLANE:
        return b_pad8, 1
    # At least 2 grid steps (v7x megacore sharding + DMA/compute overlap),
    # at most ~1024 rows per step (VMEM headroom on all generations).
    n_steps = max(2, pl.cdiv(b_pad8, _MAX_BLOCK_B))
    block_b = _round_up(pl.cdiv(b_pad8, n_steps), _SUBLANE)
    n_steps = pl.cdiv(B, block_b)
    return block_b, n_steps


def _dlinear_kernel(x_ref, w_ref, b_ref, o_ref):
    # x_ref : (Bt, L)     input block (OT channel, sequence on lanes)
    # w_ref : (L, P_pad)  folded weight  Ws + M @ (Wt - Ws), lane-padded
    # b_ref : (1, P_pad)  combined bias (bs + bt), lane-padded
    # o_ref : (Bt, P_pad) output block (lane-dense)
    x = x_ref[...].astype(jnp.float32)
    out = jnp.dot(x, w_ref[...], preferred_element_type=jnp.float32) + b_ref[...]
    o_ref[...] = out.astype(o_ref.dtype)


def dlinear_leakproof_forward_from_ot(x_ot, w_seasonal, b_seasonal,
                                      w_trend, b_trend, *, kernel_size):
    """Fused DLinear_Leakproof forward on a pre-extracted OT series.

    x_ot: (B, L) -> (B, pred_len)
    """
    B, L = x_ot.shape
    P = w_seasonal.shape[0]
    assert kernel_size % 2 == 1, "DLinear moving-average kernel_size must be odd"
    assert w_seasonal.shape == (P, L) and w_trend.shape == (P, L)
    assert b_seasonal.shape == (P,) and b_trend.shape == (P,)

    # ---- offline fold (tiny XLA ops, done once per set of weights) ---------
    m = _moving_avg_matrix(L, kernel_size)                      # (L, L)
    ws = jnp.transpose(w_seasonal).astype(jnp.float32)          # (L, P)
    wt = jnp.transpose(w_trend).astype(jnp.float32)             # (L, P)
    w_fold = ws + jnp.dot(m, wt - ws)                           # (L, P)
    bias = (b_seasonal + b_trend).astype(jnp.float32)           # (P,)

    # Lane-dense output: pad P up to a multiple of 128.
    P_pad = _round_up(P, _LANE)
    if P_pad != P:
        w_fold = jnp.pad(w_fold, ((0, 0), (0, P_pad - P)))
        bias = jnp.pad(bias, (0, P_pad - P))
    bias = bias.reshape(1, P_pad)

    # Batch tiling: fixed 8-aligned tiles, zero-padded batch.
    block_b, n_steps = _choose_batch_tiling(B)
    B_pad = block_b * n_steps
    if B_pad != B:
        x_ot = jnp.pad(x_ot, ((0, B_pad - B), (0, 0)))

    out = pl.pallas_call(
        _dlinear_kernel,
        out_shape=jax.ShapeDtypeStruct((B_pad, P_pad), x_ot.dtype),
        grid=(n_steps,),
        in_specs=[
            pl.BlockSpec((block_b, L), lambda i: (i, 0)),   # x_ot, tiled on batch
            pl.BlockSpec((L, P_pad), lambda i: (0, 0)),     # folded weight (resident)
            pl.BlockSpec((1, P_pad), lambda i: (0, 0)),     # bias (resident)
        ],
        out_specs=pl.BlockSpec((block_b, P_pad), lambda i: (i, 0)),
        compiler_params=pltpu.CompilerParams(
            dimension_semantics=("parallel",),
        ),
    )(x_ot, w_fold, bias)

    return out[:B, :P]


def dlinear_leakproof_forward(x, w_seasonal, b_seasonal, w_trend, b_trend,
                              *, kernel_size, ot_index=None):
    """Fused DLinear_Leakproof forward.  x: (B, L, C) -> (B, pred_len)."""
    if ot_index is None:
        ot_index = FEATURE_COLS.index('OT')
    # TODO(synk): this minor-dim strided slice reads ~C x the useful HBM bytes;
    # prefer a channel-major producer and call dlinear_leakproof_forward_from_ot.
    x_ot = x[:, :, ot_index]                                    # (B, L)
    return dlinear_leakproof_forward_from_ot(
        x_ot, w_seasonal, b_seasonal, w_trend, b_trend, kernel_size=kernel_size)


def _reference_forward(x, w_seasonal, b_seasonal, w_trend, b_trend, kernel_size):
    """Pure-JAX reference mirroring the PyTorch module exactly."""
    ot_index = FEATURE_COLS.index('OT')
    x_ot = x[:, :, ot_index]                                    # (B, L)
    pad = (kernel_size - 1) // 2
    front = jnp.repeat(x_ot[:, :1], pad, axis=1)
    end = jnp.repeat(x_ot[:, -1:], pad, axis=1)
    xp = jnp.concatenate([front, x_ot, end], axis=1)            # (B, L + 2*pad)
    L = x_ot.shape[1]
    windows = jnp.stack([xp[:, t:t + kernel_size] for t in range(L)], axis=1)
    trend = windows.mean(axis=2)                                # (B, L)
    seasonal = x_ot - trend
    return (seasonal @ w_seasonal.T + b_seasonal
            + trend @ w_trend.T + b_trend)                      # (B, P)


if __name__ == "__main__":
    KERNEL_SIZE = 25          # typical DLinear decomposition kernel (odd)
    L = INPUT_LEN             # 172
    P = PRED_LEN              # 96
    C = len(FEATURE_COLS)     # 23

    key = jax.random.PRNGKey(0)
    k1, k2, k3, k4, k5, k6 = jax.random.split(key, 6)
    w_seasonal = 0.05 * jax.random.normal(k2, (P, L), dtype=jnp.float32)
    b_seasonal = 0.05 * jax.random.normal(k3, (P,), dtype=jnp.float32)
    w_trend = 0.05 * jax.random.normal(k4, (P, L), dtype=jnp.float32)
    b_trend = 0.05 * jax.random.normal(k5, (P,), dtype=jnp.float32)

    # Primary small-shape check (B=2, padded to one 8-row block).
    B = 2
    x = jax.random.normal(k1, (B, L, C), dtype=jnp.float32)
    out = dlinear_leakproof_forward(
        x, w_seasonal, b_seasonal, w_trend, b_trend, kernel_size=KERNEL_SIZE)
    out = jax.block_until_ready(out)
    ref = _reference_forward(x, w_seasonal, b_seasonal, w_trend, b_trend, KERNEL_SIZE)
    assert out.shape == ref.shape, (out.shape, ref.shape)
    max_err = float(jnp.max(jnp.abs(out - ref)))
    assert jnp.allclose(out, ref, atol=1e-3, rtol=1e-3), f"mismatch: {max_err}"

    # Secondary check exercising the multi-step grid + batch-padding path.
    B2 = 20
    x2 = jax.random.normal(k6, (B2, L, C), dtype=jnp.float32)
    out2 = jax.block_until_ready(dlinear_leakproof_forward(
        x2, w_seasonal, b_seasonal, w_trend, b_trend, kernel_size=KERNEL_SIZE))
    ref2 = _reference_forward(x2, w_seasonal, b_seasonal, w_trend, b_trend, KERNEL_SIZE)
    assert out2.shape == ref2.shape, (out2.shape, ref2.shape)
    max_err2 = float(jnp.max(jnp.abs(out2 - ref2)))
    assert jnp.allclose(out2, ref2, atol=1e-3, rtol=1e-3), f"mismatch: {max_err2}"

    print("KERNEL_OK")
</pallas_src>

<mosaic_0001>
module attributes {stable_mosaic.version = 11 : i64} {
  func.func @_dlinear_kernel(%arg0: i32, %arg1: memref<8x172xf32, #tpu.memory_space<vmem>>, %arg2: memref<172x128xf32, #tpu.memory_space<vmem>>, %arg3: memref<1x128xf32, #tpu.memory_space<vmem>>, %arg4: memref<8x128xf32, #tpu.memory_space<vmem>>) attributes {dimension_semantics = [#tpu.dimension_semantics<parallel>], iteration_bounds = array<i64: 1>, scalar_prefetch = 0 : i64, scratch_operands = 0 : i64, tpu.core_type = #tpu.core_type<tc>, window_params = [{transform_indices = @transform_0, window_bounds = array<i64: 8, 172>}, {pipeline_mode = #tpu.pipeline_mode<synchronous>, transform_indices = @transform_1, window_bounds = array<i64: 172, 128>}, {pipeline_mode = #tpu.pipeline_mode<synchronous>, transform_indices = @transform_2, window_bounds = array<i64: 1, 128>}, {transform_indices = @transform_3, window_bounds = array<i64: 8, 128>}]} {
    %c0 = arith.constant 0 : index
    %c0_0 = arith.constant 0 : index
    %0 = vector.load %arg1[%c0, %c0_0] : memref<8x172xf32, #tpu.memory_space<vmem>>, vector<8x172xf32>
    %c0_1 = arith.constant 0 : index
    %c0_2 = arith.constant 0 : index
    %1 = vector.load %arg2[%c0_1, %c0_2] : memref<172x128xf32, #tpu.memory_space<vmem>>, vector<172x128xf32>
    %cst = arith.constant dense<0.000000e+00> : vector<8x128xf32>
    %2 = tpu.matmul %0, %1, %cst {dimension_numbers = #tpu.dot_dimension_numbers<[1], [0], [0], [1], [0, 0, 1, 1], [], []>} : vector<8x172xf32>, vector<172x128xf32>, vector<8x128xf32> -> vector<8x128xf32>
    %c0_3 = arith.constant 0 : index
    %c0_4 = arith.constant 0 : index
    %3 = vector.load %arg3[%c0_3, %c0_4] : memref<1x128xf32, #tpu.memory_space<vmem>>, vector<1x128xf32>
    %4 = vector.broadcast %3 : vector<1x128xf32> to vector<8x128xf32>
    %5 = arith.addf %2, %4 : vector<8x128xf32>
    %c0_5 = arith.constant 0 : index
    %c0_6 = arith.constant 0 : index
    %6 = vector.load %arg4[%c0_5, %c0_6] : memref<8x128xf32, #tpu.memory_space<vmem>>, vector<8x128xf32>
    tpu.vector_store %arg4[%c0_5, %c0_6], %5 {strides = array<i32>} : memref<8x128xf32, #tpu.memory_space<vmem>>, vector<8x128xf32>,
    return
  }
  func.func @transform_0(%arg0: i32) -> (i32, i32) {
    %c0_i32 = arith.constant 0 : i32
    %c0_i32_0 = arith.constant 0 : i32
    return %arg0, %c0_i32 : i32, i32
  }
  func.func @transform_1(%arg0: i32) -> (i32, i32) {
    %c0_i32 = arith.constant 0 : i32
    %c0_i32_0 = arith.constant 0 : i32
    %c0_i32_1 = arith.constant 0 : i32
    return %c0_i32, %c0_i32_0 : i32, i32
  }
  func.func @transform_2(%arg0: i32) -> (i32, i32) {
    %c0_i32 = arith.constant 0 : i32
    %c0_i32_0 = arith.constant 0 : i32
    %c0_i32_1 = arith.constant 0 : i32
    return %c0_i32, %c0_i32_0 : i32, i32
  }
  func.func @transform_3(%arg0: i32) -> (i32, i32) {
    %c0_i32 = arith.constant 0 : i32
    %c0_i32_0 = arith.constant 0 : i32
    return %arg0, %c0_i32 : i32, i32
  }
}

</mosaic_0001>

<bundles_post_ra>
// kernel: tpu_custom_call.1
= control target key start
LH: loop header
LB: loop body
LE: loop exit
PB: predicated region body
PF: predicated region fallthrough
CT: control target
= control target key end

     0   :  { %8 = vsyncpa [#allocation3], 0  ;;  %s356_s0 = inlined_call_operand.hbm [shape: f32[8,172], index: 0, kind: input, shape index: {}]   ;;  %s357_s1 = inlined_call_operand.hbm [shape: f32[172,128], index: 1, kind: input, shape index: {}]   ;;  %s358_s2 = inlined_call_operand.vmem [shape: f32[1,128], index: 2, kind: input, shape index: {}]   ;;  %s359_s3 = inlined_call_operand.hbm [shape: f32[8,128], index: 3, kind: output, shape index: {}]  }
   0x1   :  { %9 = vsyncpa [#allocation6], 0 }
   0x2   :  { %10 = vsyncpa [#allocation4], 0  ;;  %s283_s12 = smov [#allocation2]   ;;  %s284_s14 = smov [#allocation5]  }
   0x3   :  { %s17_s13 = sshll.u32 %s283_s12, 4  ;;  %s26_s15 = sshll.u32 %s284_s14, 4  ;;  %s18_s13 = int_to_ptr.vmem [resolvable:$true] %s17_s13  ;;  %s310_s15 = int_to_ptr.vmem [resolvable:$true] %s26_s15 }
   0x4   :  { %s211_s18 = scalar_lea.hbm %s356_s0, 256 }
   0x5   :  { %p212_p0 = scmp.ne.s32.totalorder %s356_s0, %s211_s18  ;;  %p215_p1 = scmp.lt.u32.totalorder %s211_s18, %s356_s0 }
   0x7   :  { %p217_p2 = pnand %p215_p1, %p212_p0 }
   0x9   :  { %220 = shalt.err (!%p217_p2)
}
   0xa   :  { %s221_s23 = scalar_lea.vmem %s18_s13, 256  ;;  %p226_p4 = scmp.lt.s32.totalorder %s18_s13, %s18_s13 }
   0xb   :  { %p222_p3 = scmp.ne.s32.totalorder %s18_s13, %s221_s23  ;;  %p227_p5 = scmp.lt.s32.totalorder %s221_s23, %s221_s23 }
   0xd   :  { %p228_p6 = por %p227_p5, %p226_p4 }
   0xf   :  { %p229_p7 = pnand %p228_p6, %p222_p3 }
  0x11   :  { %232 = shalt.err (!%p229_p7)
}
  0x12   :  { %20 = dma.hbm_to_vmem [thread:$0]  %s356_s0, 256, %s18_s13, [#allocation3]  }
  0x13   :  { %s233_s28 = scalar_lea.hbm %s357_s1, 2816 }
  0x14   :  { %p234_p8 = scmp.ne.s32.totalorder %s357_s1, %s233_s28  ;;  %p237_p9 = scmp.lt.u32.totalorder %s233_s28, %s357_s1 }
  0x16   :  { %p239_p10 = pnand %p237_p9, %p234_p8 }
  0x18   :  { %242 = shalt.err (!%p239_p10)
}
  0x19   :  { %s243_s6 = scalar_lea.vmem %s310_s15, 2816  ;;  %p248_p12 = scmp.lt.s32.totalorder %s310_s15, %s310_s15 }
  0x1a   :  { %p244_p11 = scmp.ne.s32.totalorder %s310_s15, %s243_s6  ;;  %p249_p13 = scmp.lt.s32.totalorder %s243_s6, %s243_s6 }
  0x1c   :  { %p250_p0 = por %p249_p13, %p248_p12 }
  0x1e   :  { %p251_p1 = pnand %p250_p0, %p244_p11 }
  0x20   :  { %254 = shalt.err (!%p251_p1)
}
  0x21   :  { %s285_s0 = smov 128   ;;  %s286_s7 = smov 8  }
  0x22   :  { %32 = dma.hbm_to_vmem [thread:$0]  %s357_s1, 2816, %s310_s15, [#allocation6], %s285_s0, %s285_s0, %s286_s7  }
  0x23   :  { %277 = dma.done.wait [#allocation3], 256  }
  0x24   :  { %278 = vsyncadd [#allocation3], 4294967040 }
  0x25   :  { %279 = dma.done.wait [#allocation6], 2816  }
  0x26   :  { %280 = vsyncadd [#allocation6], 4294964480  ;;  %v287_v0 = vmov 0.0|0.0   ;;  %v43_v1 = vld [vmem:[#allocation5] sm:$0xff]  ;;  %v44_v2 = vld [vmem:[#allocation5 + $0x8] sm:$0xff]  ;;  %vm72_vm0 = vcmask 359424  }
  0x27   :  { %170 = vmatprep.subr.bf16.mxu0 %v287_v0  ;;  %v45_v3 = vld [vmem:[#allocation5 + $0x10] sm:$0xff]  ;;  %v171_v4 = vpack.c.bf16 %v44_v2, %v43_v1  ;;  %v46_v5 = vld [vmem:[#allocation5 + $0x18] sm:$0xff]  ;;  %v47_v7 = vld [vmem:[#allocation5 + $0x20] sm:$0xff]  ;;  %vm76_vm1 = vcmask 1043456   ;;  %vm288_vm2 = vmmov 1   ;;  %s289_s11 = smov [#allocation7]  }
  0x28   :  { %v174_v6 = vpack.c.bf16 %v46_v5, %v45_v3  ;;  %v48_v8 = vld [vmem:[#allocation5 + $0x28] sm:$0xff]  ;;  %v42_v10 = vld [vmem:[#allocation2 + $0x8] sm:$0xff]  ;;  %v49_v11 = vld [vmem:[#allocation5 + $0x30] sm:$0xff]  ;;  %s157_s12 = sshll.u32 %s289_s11, 4  ;;  %s158_s12 = int_to_ptr.vmem [resolvable:$true] %s157_s12 }
  0x29   :  { %172 = vmatpush1.bf16.msra.mxu0 %v171_v4  ;;  %v177_v9 = vpack.c.bf16 %v48_v8, %v47_v7  ;;  %v50_v12 = vld [vmem:[#allocation5 + $0x38] sm:$0xff]  ;;  %169 = vmatprep.mubr.msk.f32.mxu0 %vm72_vm0, %v42_v10  ;;  %v51_v14 = vld [vmem:[#allocation5 + $0x40] sm:$0xff]  ;;  %v52_v15 = vld [vmem:[#allocation5 + $0x48] sm:$0xff]  ;;  %s255_s13 = scalar_lea.vmem %s158_s12, 128  ;;  %p260_p3 = scmp.lt.s32.totalorder %s158_s12, %s158_s12 }
  0x2a   :  { %173 = vmatprep.subr.bf16.mxu0 %v287_v0  ;;  %v180_v13 = vpack.c.bf16 %v50_v12, %v49_v11  ;;  %v183_v16 = vpack.c.bf16 %v52_v15, %v51_v14  ;;  %v53_v17 = vld [vmem:[#allocation5 + $0x50] sm:$0xff]  ;;  %v54_v18 = vld [vmem:[#allocation5 + $0x58] sm:$0xff]  ;;  %v55_v20 = vld [vmem:[#allocation5 + $0x60] sm:$0xff]  ;;  %p256_p2 = scmp.ne.s32.totalorder %s158_s12, %s255_s13  ;;  %p261_p4 = scmp.lt.s32.totalorder %s255_s13, %s255_s13 }
  0x2b   :  { %v186_v19 = vpack.c.bf16 %v54_v18, %v53_v17  ;;  %v56_v21 = vld [vmem:[#allocation5 + $0x68] sm:$0xff]  ;;  %v57_v23 = vld [vmem:[#allocation5 + $0x70] sm:$0xff]  ;;  %v58_v24 = vld [vmem:[#allocation5 + $0x78] sm:$0xff] }
  0x2c   :  { %v189_v22 = vpack.c.bf16 %v56_v21, %v55_v20  ;;  %v192_v25 = vpack.c.bf16 %v58_v24, %v57_v23  ;;  %v59_v26 = vld [vmem:[#allocation5 + $0x80] sm:$0xff]  ;;  %v60_v27 = vld [vmem:[#allocation5 + $0x88] sm:$0xff]  ;;  %v61_v29 = vld [vmem:[#allocation5 + $0x90] sm:$0xff]  ;;  %p262_p5 = por %p261_p4, %p260_p3 }
  0x2d   :  { %175 = vmatpush1.bf16.msra.mxu0 %v174_v6  ;;  %v195_v28 = vpack.c.bf16 %v60_v27, %v59_v26  ;;  %v62_v30 = vld [vmem:[#allocation5 + $0x98] sm:$0xff]  ;;  %v63_v32 = vld [vmem:[#allocation5 + $0xa0] sm:$0xff]  ;;  %v64_v33 = vld [vmem:[#allocation5 + $0xa8] sm:$0xf] }
  0x2e   :  { %176 = vmatprep.subr.bf16.mxu0 %v287_v0  ;;  %v198_v31 = vpack.c.bf16 %v62_v30, %v61_v29  ;;  %v201_v34 = vpack.c.bf16 %v64_v33, %v63_v32  ;;  %vm202_vm3 = vmpackc.low %vm76_vm1, %vm288_vm2  ;;  %v41_v35 = vld [vmem:[#allocation2] sm:$0xff]  ;;  %p263_p6 = pnand %p262_p5, %p256_p2 }
  0x2f   :  { %v167_v36 = vld [vmem:[%s358_s2] ss:$0 sm:$0xff] }
  0x31   :  { %178 = vmatpush1.bf16.msra.mxu0 %v177_v9 }
  0x32   :  { %179 = vmatprep.subr.bf16.mxu0 %v287_v0 }
  0x35   :  { %181 = vmatpush1.bf16.msra.mxu0 %v180_v13 }
  0x36   :  { %182 = vmatprep.subr.bf16.mxu0 %v287_v0 }
  0x39   :  { %184 = vmatpush1.bf16.msra.mxu0 %v183_v16 }
  0x3a   :  { %185 = vmatprep.subr.bf16.mxu0 %v287_v0 }
  0x3d   :  { %187 = vmatpush1.bf16.msra.mxu0 %v186_v19 }
  0x3e   :  { %188 = vmatprep.subr.bf16.mxu0 %v287_v0 }
  0x41   :  { %190 = vmatpush1.bf16.msra.mxu0 %v189_v22 }
  0x42   :  { %191 = vmatprep.subr.bf16.mxu0 %v287_v0 }
  0x45   :  { %193 = vmatpush1.bf16.msra.mxu0 %v192_v25 }
  0x46   :  { %194 = vmatprep.subr.bf16.mxu0 %v287_v0 }
  0x49   :  { %196 = vmatpush1.bf16.msra.mxu0 %v195_v28 }
  0x4a   :  { %197 = vmatprep.subr.bf16.mxu0 %v287_v0 }
  0x4d   :  { %199 = vmatpush1.bf16.msra.mxu0 %v198_v31 }
  0x4e   :  { %200 = vmatprep.subr.bf16.mxu0 %v287_v0 }
  0x51   :  { %203 = vmatpush1.bf16.msk.msra.mxu0 %vm202_vm3, %v201_v34 }
  0x54   :  { %145 = vmatmul.mubr.f32.vlgmr.msra.gmra.mrb[0].mxu0 %v41_v35 }
 0x127   :  { %v146_v37 = vpop.f32.mrb[0].mxu0 }
 0x128   :  { %v147_v38 = vadd.f32 %v167_v36, %v146_v37  ;;  %v148_v39 = vpop.f32.mrb[1].mxu0 }
 0x12a   :  { %150 = vst [vmem:[#allocation7] sm:$0xff] %v147_v38 }
 0x12b   :  { %266 = shalt.err (!%p263_p6)
}
 0x12c   :  { %s267_s16 = scalar_lea.hbm %s359_s3, 128 }
 0x12d   :  { %p268_p7 = scmp.ne.s32.totalorder %s359_s3, %s267_s16  ;;  %p271_p8 = scmp.lt.u32.totalorder %s267_s16, %s359_s3 }
 0x12f   :  { %p273_p9 = pnand %p271_p8, %p268_p7 }
 0x131   :  { %276 = shalt.err (!%p273_p9)
}
 0x132   :  { %160 = dma.vmem_to_hbm [thread:$0]  %s158_s12, 128, %s359_s3, [#allocation4]  }
 0x133   :  { %281 = dma.done.wait [#allocation4], 128  }
 0x134   :  { %282 = vsyncadd [#allocation4], 4294967168 }
 0x135   :  { %164 = vsyncpa [#allocation3], 1 }
 0x136   :  { %165 = vsyncpa [#allocation6], 1 }
 0x137   :  { %166 = vsyncpa [#allocation4], 1 }

</bundles_post_ra>
